<compile_context>
chip_gen: v6e
topology: v6e:2x2x1
jax: 0.10.0
libtpu: 0.0.40
codegen_flags: <defaults>
</compile_context>

<pallas_src>
import functools
import math

import jax
import jax.numpy as jnp
from jax import lax
from jax.experimental import pallas as pl
from jax.experimental.pallas import tpu as pltpu


# ----------------------------------------------------------------------------
# helpers
# ----------------------------------------------------------------------------
def _pick_tile(dim, target, align):
    """Largest tile <= target that divides `dim` and is a multiple of `align`;
    falls back to the full dim (always a legal TPU block)."""
    if dim <= target or dim % align != 0:
        return dim
    t = max(align, (target // align) * align)
    while dim % t != 0:
        t -= align
    return t


_MAX_BLOCK_VMEM_BYTES = 96 * 1024 * 1024  # guard the full-dim fallback against VMEM blowups


def _check_vmem(nbytes, what):
    if nbytes > _MAX_BLOCK_VMEM_BYTES:
        raise ValueError(
            f"{what}: per-step working set ~{nbytes / 2**20:.1f} MiB exceeds the VMEM "
            "budget; pad the problem to TPU-friendly multiples instead of relying on "
            "the full-dim fallback."
        )


# ----------------------------------------------------------------------------
# Kernel 1: tiled matmul, bf16 operands, f32 accumulator (c_attn / c_proj)
# ----------------------------------------------------------------------------
def _matmul_kernel(a_ref, b_ref, o_ref, acc_ref):
    @pl.when(pl.program_id(2) == 0)
    def _init():
        acc_ref[...] = jnp.zeros_like(acc_ref)

    acc_ref[...] += jnp.dot(a_ref[...], b_ref[...], preferred_element_type=jnp.float32)

    @pl.when(pl.program_id(2) == pl.num_programs(2) - 1)
    def _finalize():
        o_ref[...] = acc_ref[...].astype(o_ref.dtype)


def pallas_matmul(a, b, *, out_dtype=None, tm_target=512, tn_target=512, tk_target=512):
    """a: (M, K), b: (K, N) -> (M, N), tiled and accumulated over K in f32."""
    M, K = a.shape
    K2, N = b.shape
    assert K == K2
    out_dtype = out_dtype if out_dtype is not None else a.dtype
    tm = _pick_tile(M, tm_target, 8)
    tn = _pick_tile(N, tn_target, 128)
    tk = _pick_tile(K, tk_target, 128)

    in_item = jnp.dtype(a.dtype).itemsize
    out_item = jnp.dtype(out_dtype).itemsize
    _check_vmem(
        2 * (tm * tk + tk * tn) * in_item + tm * tn * (4 + 2 * out_item),
        "pallas_matmul",
    )

    grid = (M // tm, N // tn, K // tk)
    return pl.pallas_call(
        _matmul_kernel,
        out_shape=jax.ShapeDtypeStruct((M, N), out_dtype),
        grid=grid,
        in_specs=[
            pl.BlockSpec((tm, tk), lambda i, j, k: (i, k)),
            pl.BlockSpec((tk, tn), lambda i, j, k: (k, j)),
        ],
        out_specs=pl.BlockSpec((tm, tn), lambda i, j, k: (i, j)),
        scratch_shapes=[pltpu.VMEM((tm, tn), jnp.float32)],
        compiler_params=pltpu.CompilerParams(
            dimension_semantics=("parallel", "parallel", "arbitrary")
        ),
    )(a, b)


# ----------------------------------------------------------------------------
# Kernel 2: fused head-split + rotary + scale, qkv (B,T,3C) -> q/k/v (B,H,T,D)
# ----------------------------------------------------------------------------
def _split_rotary_kernel(qkv_ref, cos_ref, sin_ref, q_ref, k_ref, v_ref, *,
                         n_head, head_dim, scale):
    # qkv_ref: (blk_t, 3C) bf16; cos/sin: (blk_t, D//2) f32
    # q_ref/k_ref/v_ref: (H, blk_t, D)
    cos = cos_ref[...]
    sin = sin_ref[...]
    x = qkv_ref[...]
    C = n_head * head_dim
    d = head_dim // 2
    for h in range(n_head):  # static unroll; H is small
        qo = h * head_dim
        ko = C + h * head_dim
        vo = 2 * C + h * head_dim
        q1 = x[:, qo:qo + d].astype(jnp.float32)
        q2 = x[:, qo + d:qo + head_dim].astype(jnp.float32)
        k1 = x[:, ko:ko + d].astype(jnp.float32)
        k2 = x[:, ko + d:ko + head_dim].astype(jnp.float32)
        # apply_rotary_emb: y1 = x1*cos + x2*sin ; y2 = -x1*sin + x2*cos
        # concat -> a single full-head-width store; 1/sqrt(D) folded into q.
        q_rot = jnp.concatenate([q1 * cos + q2 * sin, q2 * cos - q1 * sin], axis=-1) * scale
        k_rot = jnp.concatenate([k1 * cos + k2 * sin, k2 * cos - k1 * sin], axis=-1)
        q_ref[h] = q_rot.astype(q_ref.dtype)
        k_ref[h] = k_rot.astype(k_ref.dtype)
        v_ref[h] = x[:, vo:vo + head_dim].astype(v_ref.dtype)


def pallas_split_rotary(qkv, cos, sin, *, n_head, head_dim, scale, blk_t_target=256):
    """qkv: (B, T, 3C) -> (q, k, v) each (B, H, T, D); rotary applied to q, k and the
    attention scale folded into q. The head-split transpose happens via BlockSpecs."""
    B, T, C3 = qkv.shape
    blk_t = _pick_tile(T, blk_t_target, 8)
    item = jnp.dtype(qkv.dtype).itemsize
    _check_vmem(2 * blk_t * C3 * item + 3 * 2 * n_head * blk_t * head_dim * item,
                "pallas_split_rotary")

    grid = (B, T // blk_t)
    qkv_spec = pl.BlockSpec((None, blk_t, C3), lambda b, ti: (b, ti, 0))
    tbl_spec = pl.BlockSpec((blk_t, head_dim // 2), lambda b, ti: (ti, 0))
    out_spec = pl.BlockSpec((None, n_head, blk_t, head_dim), lambda b, ti: (b, 0, ti, 0))
    out_sds = jax.ShapeDtypeStruct((B, n_head, T, head_dim), qkv.dtype)
    return pl.pallas_call(
        functools.partial(_split_rotary_kernel, n_head=n_head, head_dim=head_dim,
                          scale=scale),
        out_shape=(out_sds, out_sds, out_sds),
        grid=grid,
        in_specs=[qkv_spec, tbl_spec, tbl_spec],
        out_specs=(out_spec, out_spec, out_spec),
        compiler_params=pltpu.CompilerParams(
            dimension_semantics=("parallel", "parallel")
        ),
    )(qkv, cos, sin)


# ----------------------------------------------------------------------------
# Kernel 3: flash-style causal attention (online softmax, block-causal skipping,
#           clamped kv index_map so skipped blocks cost no DMA)
# ----------------------------------------------------------------------------
_NEG_INF = -1e30


def _flash_attn_kernel(q_ref, k_ref, v_ref, o_ref, m_scr, l_scr, acc_scr):
    # q_ref/o_ref: (Bq, D); k_ref/v_ref: (Bk, D) with Bq == Bk.
    qi = pl.program_id(2)
    ki = pl.program_id(3)

    @pl.when(ki == 0)
    def _init():
        m_scr[...] = jnp.full_like(m_scr, _NEG_INF)
        l_scr[...] = jnp.zeros_like(l_scr)
        acc_scr[...] = jnp.zeros_like(acc_scr)

    def _update(s):
        m_prev = m_scr[...]
        m_new = jnp.maximum(m_prev, jnp.max(s, axis=-1, keepdims=True))
        alpha = jnp.exp(m_prev - m_new)
        p = jnp.exp(s - m_new)
        l_scr[...] = alpha * l_scr[...] + jnp.sum(p, axis=-1, keepdims=True)
        acc_scr[...] = alpha * acc_scr[...] + jnp.dot(
            p.astype(v_ref.dtype), v_ref[...], preferred_element_type=jnp.float32
        )
        m_scr[...] = m_new

    # Block-level causality (block_q == block_kv): above-diagonal blocks are skipped
    # entirely; only the diagonal block builds an iota mask.
    @pl.when(ki <= qi)
    def _run():
        # q is pre-rotated and pre-scaled by 1/sqrt(D); contract last dims directly
        # (no explicit k.T -> no relayout before the MXU).
        s = lax.dot_general(
            q_ref[...], k_ref[...],
            dimension_numbers=(((1,), (1,)), ((), ())),
            preferred_element_type=jnp.float32,
        )  # (Bq, Bk) f32

        @pl.when(ki < qi)
        def _below_diag():
            _update(s)

        @pl.when(ki == qi)
        def _on_diag():
            rows = lax.broadcasted_iota(jnp.int32, s.shape, 0)
            cols = lax.broadcasted_iota(jnp.int32, s.shape, 1)
            _update(jnp.where(cols <= rows, s, _NEG_INF))

    @pl.when(ki == pl.num_programs(3) - 1)
    def _finalize():
        o_ref[...] = (
            acc_scr[...] * pl.reciprocal(l_scr[...], approx=True)
        ).astype(o_ref.dtype)


def pallas_causal_flash_attention(q, k, v, *, block_target=256):
    """q, k, v: (B, H, T, D) with q pre-scaled by 1/sqrt(D). Returns (B, H, T, D)."""
    B, H, T, D = q.shape
    blk = _pick_tile(T, block_target, 128)  # 128-aligned lanes for the score tile
    _check_vmem(3 * blk * blk * 4 + 8 * blk * D * 4, "pallas_causal_flash_attention")
    nblk = T // blk
    grid = (B, H, nblk, nblk)

    q_spec = pl.BlockSpec((None, None, blk, D), lambda b, h, qi, ki: (b, h, qi, 0))
    # Clamp the kv block index: for ki > qi the index repeats, so Pallas elides the
    # DMA for blocks that the kernel skips anyway (halves causal K/V HBM traffic).
    kv_spec = pl.BlockSpec(
        (None, None, blk, D), lambda b, h, qi, ki: (b, h, jnp.minimum(ki, qi), 0)
    )
    return pl.pallas_call(
        _flash_attn_kernel,
        out_shape=jax.ShapeDtypeStruct((B, H, T, D), q.dtype),
        grid=grid,
        in_specs=[q_spec, kv_spec, kv_spec],
        out_specs=pl.BlockSpec((None, None, blk, D), lambda b, h, qi, ki: (b, h, qi, 0)),
        scratch_shapes=[
            pltpu.VMEM((blk, 1), jnp.float32),   # running max
            pltpu.VMEM((blk, 1), jnp.float32),   # running sum
            pltpu.VMEM((blk, D), jnp.float32),   # output accumulator
        ],
        compiler_params=pltpu.CompilerParams(
            dimension_semantics=("parallel", "parallel", "parallel", "arbitrary")
        ),
    )(q, k, v)


# ----------------------------------------------------------------------------
# Module wrapper
# ----------------------------------------------------------------------------
@functools.lru_cache(maxsize=8)
def rotary_tables(T, head_dim, base=10000.0):
    # kept in f32; cast happens only when the rotated values are stored.
    inv_freq = 1.0 / (base ** (jnp.arange(0, head_dim, 2, dtype=jnp.float32) / head_dim))
    t = jnp.arange(T, dtype=jnp.float32)
    freqs = jnp.outer(t, inv_freq)  # (T, head_dim // 2)
    return jnp.cos(freqs), jnp.sin(freqs)


def init_params(key, n_embd, dtype=jnp.bfloat16):
    k1, k2 = jax.random.split(key)
    std = 0.02
    w_attn = (std * jax.random.normal(k1, (n_embd, 3 * n_embd), jnp.float32)).astype(dtype)
    w_proj = (std * jax.random.normal(k2, (n_embd, n_embd), jnp.float32)).astype(dtype)
    return {"w_attn": w_attn, "w_proj": w_proj}


def causal_self_attention(params, x, n_head, *, compute_dtype=jnp.bfloat16):
    """Forward pass of CausalSelfAttention. x: (B, T, C) -> (B, T, C)."""
    B, T, C = x.shape
    D = C // n_head
    out_dtype = x.dtype

    x_lp = x.astype(compute_dtype)
    w_attn = params["w_attn"].astype(compute_dtype)
    w_proj = params["w_proj"].astype(compute_dtype)

    # fused qkv projection (bf16 MXU, f32 accumulation)
    qkv = pallas_matmul(x_lp.reshape(B * T, C), w_attn, out_dtype=compute_dtype)
    qkv = qkv.reshape(B, T, 3 * C)  # pure dim-split reshape: no HBM pass

    # fused head-split + rotary + 1/sqrt(D) scaling, written directly in (B,H,T,D)
    cos, sin = rotary_tables(T, D)
    q, k, v = pallas_split_rotary(qkv, cos, sin, n_head=n_head, head_dim=D,
                                  scale=1.0 / math.sqrt(D))

    # flash attention with block-causal skipping + clamped K/V DMA
    y = pallas_causal_flash_attention(q, k, v)  # (B, H, T, D) bf16

    # TODO(synk): fold this merge-heads transpose into the c_proj matmul's in_specs
    # (reduce over heads with (tm, D) A-blocks) to drop the last layout HBM pass.
    y = y.transpose(0, 2, 1, 3).reshape(B * T, C)
    y = pallas_matmul(y, w_proj, out_dtype=out_dtype)
    return y.reshape(B, T, C)


# ----------------------------------------------------------------------------
# Pure-JAX reference (f32 math, same bf16-stored params)
# ----------------------------------------------------------------------------
def reference(params, x, n_head):
    B, T, C = x.shape
    D = C // n_head
    w_attn = params["w_attn"].astype(jnp.float32)
    w_proj = params["w_proj"].astype(jnp.float32)
    qkv = x @ w_attn
    q, k, v = jnp.split(qkv, 3, axis=-1)
    q = q.reshape(B, T, n_head, D)
    k = k.reshape(B, T, n_head, D)
    v = v.reshape(B, T, n_head, D)
    cos, sin = rotary_tables(T, D)
    cos = cos[None, :, None, :]
    sin = sin[None, :, None, :]

    def rot(t):
        d = D // 2
        t1, t2 = t[..., :d], t[..., d:]
        return jnp.concatenate([t1 * cos + t2 * sin, -t1 * sin + t2 * cos], axis=-1)

    q, k = rot(q), rot(k)
    q = q.transpose(0, 2, 1, 3)
    k = k.transpose(0, 2, 1, 3)
    v = v.transpose(0, 2, 1, 3)
    s = jnp.einsum("bhqd,bhkd->bhqk", q, k) / math.sqrt(D)
    mask = jnp.tril(jnp.ones((T, T), dtype=bool))
    s = jnp.where(mask, s, -1e30)
    p = jax.nn.softmax(s, axis=-1)
    y = jnp.einsum("bhqk,bhkd->bhqd", p, v)
    y = y.transpose(0, 2, 1, 3).reshape(B, T, C)
    return y @ w_proj


if __name__ == "__main__":
    # small shapes consistent with the module: B=2, T=8, n_embd=32, n_head=4 (head_dim=8)
    B, T, n_embd, n_head = 2, 8, 32, 4

    key = jax.random.PRNGKey(0)
    kx, kp = jax.random.split(key)
    x = jax.random.normal(kx, (B, T, n_embd), dtype=jnp.float32)
    params = init_params(kp, n_embd)

    y = jax.block_until_ready(causal_self_attention(params, x, n_head))
    y_ref = reference(params, x, n_head)

    assert y.shape == (B, T, n_embd)
    assert y.dtype == x.dtype
    # tolerance accommodates bf16 MXU inputs + approx-reciprocal softmax normalization
    max_err = float(jnp.max(jnp.abs(y - y_ref)))
    assert jnp.allclose(y, y_ref, atol=1e-2, rtol=1e-2), f"mismatch vs reference (max abs err {max_err})"

    print("KERNEL_OK")
</pallas_src>

<mosaic_0001>
module attributes {stable_mosaic.version = 11 : i64} {
  func.func @_matmul_kernel(%arg0: i32, %arg1: i32, %arg2: i32, %arg3: memref<16x32xbf16, #tpu.memory_space<vmem>>, %arg4: memref<32x96xbf16, #tpu.memory_space<vmem>>, %arg5: memref<16x96xbf16, #tpu.memory_space<vmem>>, %arg6: memref<16x96xf32, #tpu.memory_space<vmem>>) attributes {dimension_semantics = [#tpu.dimension_semantics<parallel>, #tpu.dimension_semantics<parallel>, #tpu.dimension_semantics<arbitrary>], iteration_bounds = array<i64: 1, 1, 1>, scalar_prefetch = 0 : i64, scratch_operands = 1 : i64, tpu.core_type = #tpu.core_type<tc>, window_params = [{transform_indices = @transform_0, window_bounds = array<i64: 16, 32>}, {transform_indices = @transform_1, window_bounds = array<i64: 32, 96>}, {transform_indices = @transform_2, window_bounds = array<i64: 16, 96>}]} {
    %c0_i32 = arith.constant 0 : i32
    %0 = arith.cmpi eq, %arg2, %c0_i32 : i32
    %1 = arith.extui %0 : i1 to i32
    %c0_i32_0 = arith.constant 0 : i32
    %2 = arith.cmpi ne, %1, %c0_i32_0 : i32
    scf.if %2 {
      %cst_10 = arith.constant 0.000000e+00 : f32
      %12 = vector.broadcast %cst_10 : f32 to vector<16x96xf32>
      %c0_11 = arith.constant 0 : index
      %c0_12 = arith.constant 0 : index
      %13 = vector.load %arg6[%c0_11, %c0_12] : memref<16x96xf32, #tpu.memory_space<vmem>>, vector<16x96xf32>
      tpu.vector_store %arg6[%c0_11, %c0_12], %12 {strides = array<i32>} : memref<16x96xf32, #tpu.memory_space<vmem>>, vector<16x96xf32>,
    } else {
    }
    %c0 = arith.constant 0 : index
    %c0_1 = arith.constant 0 : index
    %3 = vector.load %arg6[%c0, %c0_1] : memref<16x96xf32, #tpu.memory_space<vmem>>, vector<16x96xf32>
    %c0_2 = arith.constant 0 : index
    %c0_3 = arith.constant 0 : index
    %4 = vector.load %arg3[%c0_2, %c0_3] : memref<16x32xbf16, #tpu.memory_space<vmem>>, vector<16x32xbf16>
    %c0_4 = arith.constant 0 : index
    %c0_5 = arith.constant 0 : index
    %5 = vector.load %arg4[%c0_4, %c0_5] : memref<32x96xbf16, #tpu.memory_space<vmem>>, vector<32x96xbf16>
    %cst = arith.constant dense<0.000000e+00> : vector<16x96xf32>
    %6 = tpu.matmul %4, %5, %cst {dimension_numbers = #tpu.dot_dimension_numbers<[1], [0], [0], [1], [0, 0, 1, 1], [], []>} : vector<16x32xbf16>, vector<32x96xbf16>, vector<16x96xf32> -> vector<16x96xf32>
    %7 = arith.addf %3, %6 : vector<16x96xf32>
    %c0_6 = arith.constant 0 : index
    %c0_7 = arith.constant 0 : index
    %8 = vector.load %arg6[%c0_6, %c0_7] : memref<16x96xf32, #tpu.memory_space<vmem>>, vector<16x96xf32>
    tpu.vector_store %arg6[%c0_6, %c0_7], %7 {strides = array<i32>} : memref<16x96xf32, #tpu.memory_space<vmem>>, vector<16x96xf32>,
    %c0_i32_8 = arith.constant 0 : i32
    %9 = arith.cmpi eq, %arg2, %c0_i32_8 : i32
    %10 = arith.extui %9 : i1 to i32
    %c0_i32_9 = arith.constant 0 : i32
    %11 = arith.cmpi ne, %10, %c0_i32_9 : i32
    scf.if %11 {
      %c0_10 = arith.constant 0 : index
      %c0_11 = arith.constant 0 : index
      %12 = vector.load %arg6[%c0_10, %c0_11] : memref<16x96xf32, #tpu.memory_space<vmem>>, vector<16x96xf32>
      %13 = arith.truncf %12 : vector<16x96xf32> to vector<16x96xbf16>
      %c0_12 = arith.constant 0 : index
      %c0_13 = arith.constant 0 : index
      %14 = vector.load %arg5[%c0_12, %c0_13] : memref<16x96xbf16, #tpu.memory_space<vmem>>, vector<16x96xbf16>
      tpu.vector_store %arg5[%c0_12, %c0_13], %13 {strides = array<i32>} : memref<16x96xbf16, #tpu.memory_space<vmem>>, vector<16x96xbf16>,
    } else {
    }
    return
  }
  func.func @transform_0(%arg0: i32, %arg1: i32, %arg2: i32) -> (i32, i32) {
    %c0_i32 = arith.constant 0 : i32
    return %arg0, %arg2 : i32, i32
  }
  func.func @transform_1(%arg0: i32, %arg1: i32, %arg2: i32) -> (i32, i32) {
    %c0_i32 = arith.constant 0 : i32
    return %arg2, %arg1 : i32, i32
  }
  func.func @transform_2(%arg0: i32, %arg1: i32, %arg2: i32) -> (i32, i32) {
    %c0_i32 = arith.constant 0 : i32
    return %arg0, %arg1 : i32, i32
  }
}

</mosaic_0001>

<bundles_post_ra>
// kernel: tpu_custom_call.1
= control target key start
LH: loop header
LB: loop body
LE: loop exit
PB: predicated region body
PF: predicated region fallthrough
CT: control target
= control target key end

     0   :  { %7 = vsyncpa [#allocation4], 0  ;;  %s296_s0 = inlined_call_operand.hbm [shape: bf16[16,32], index: 0, kind: input, shape index: {}]   ;;  %s297_s1 = inlined_call_operand.hbm [shape: bf16[32,96], index: 1, kind: input, shape index: {}]   ;;  %s298_s2 = inlined_call_operand.hbm [shape: bf16[16,96], index: 2, kind: output, shape index: {}]  }
   0x1   :  { %8 = vsyncpa [#allocation7], 0 }
   0x2   :  { %9 = vsyncpa [#allocation5], 0  ;;  %s252_s9 = smov [#allocation3]  }
   0x3   :  { %s15_s10 = sshll.u32 %s252_s9, 4  ;;  %s16_s10 = int_to_ptr.vmem [resolvable:$true] %s15_s10 }
   0x4   :  { %s194_s11 = scalar_lea.vmem %s16_s10, 128  ;;  %p199_p1 = scmp.lt.s32.totalorder %s16_s10, %s16_s10 }
   0x5   :  { %p195_p0 = scmp.ne.s32.totalorder %s16_s10, %s194_s11  ;;  %p200_p2 = scmp.lt.s32.totalorder %s194_s11, %s194_s11 }
   0x7   :  { %p201_p3 = por %p200_p2, %p199_p1 }
   0x9   :  { %p202_p4 = pnand %p201_p3, %p195_p0 }
   0xb   :  { %205 = shalt.err (!%p202_p4)
}
   0xc   :  { %s253_s12 = smov 64   ;;  %s254_s13 = smov 4  }
   0xd   :  { %21 = dma.hbm_to_vmem [thread:$0]  %s296_s0, 128, %s16_s10, [#allocation4], %s253_s12, %s253_s12, %s254_s13  }
   0xe   :  { %s255_s16 = smov [#allocation6]  }
   0xf   :  { %s27_s17 = sshll.u32 %s255_s16, 4  ;;  %s28_s17 = int_to_ptr.vmem [resolvable:$true] %s27_s17 }
  0x10   :  { %s214_s18 = scalar_lea.vmem %s28_s17, 256  ;;  %p219_p6 = scmp.lt.s32.totalorder %s28_s17, %s28_s17 }
  0x11   :  { %p215_p5 = scmp.ne.s32.totalorder %s28_s17, %s214_s18  ;;  %p220_p7 = scmp.lt.s32.totalorder %s214_s18, %s214_s18 }
  0x13   :  { %p221_p8 = por %p220_p7, %p219_p6 }
  0x15   :  { %p222_p9 = pnand %p221_p8, %p215_p5 }
  0x17   :  { %225 = shalt.err (!%p222_p9)
}
  0x18   :  { %33 = dma.hbm_to_vmem [thread:$0]  %s297_s1, 256, %s28_s17, [#allocation7], %s253_s12, %s253_s12, %s254_s13  }
  0x19   :  { %246 = dma.done.wait [#allocation4], 128  }
  0x1a   :  { %247 = vsyncadd [#allocation4], 4294967168 }
  0x1b   :  { %248 = dma.done.wait [#allocation7], 256  }
  0x1c   :  { %249 = vsyncadd [#allocation7], 4294967040  ;;  %vm45_vm0 = vcmask 785408   ;;  %v256_v0 = vmov 0.0   ;;  %vm257_vm1 = vmmov 0   ;;  %v183_v1 = vld [vmem:[#allocation6 + $0x8] sm:$0xff]  }
  0x1d   :  { %46 = vst.msk [vmem:[#allocation2] sm:$0xff] %vm45_vm0, %v256_v0  ;;  %47 = vst.msk [vmem:[#allocation2 + $0x8] sm:$0xff] %vm45_vm0, %v256_v0  ;;  %168 = vmatprep.subr.bf16.mxu0 %v256_v0  ;;  %172 = vmatprep.mubr.msk.bf16.mxu0 %vm257_vm1, %v256_v0  ;;  %v184_v2 = vld [vmem:[#allocation6] sm:$0xff]   ;;  %v185_v3 = vld [vmem:[#allocation3] sm:$0xff]   ;;  %vm73_vm2 = vcmask 261120   ;;  %vm136_vm3 = vcmask 781312  }
  0x1e   :  { %169 = vmatpush3.bf16.msra.mxu0 %v183_v1  ;;  %s258_s0 = smov [#allocation8]  }
  0x1f   :  { %170 = vmatprep.subr.bf16.mxu0 %v256_v0  ;;  %s144_s1 = sshll.u32 %s258_s0, 4  ;;  %s145_s1 = int_to_ptr.vmem [resolvable:$true] %s144_s1 }
  0x20   :  { %s226_s21 = scalar_lea.vmem %s145_s1, 128  ;;  %p231_p11 = scmp.lt.s32.totalorder %s145_s1, %s145_s1 }
  0x21   :  { %p227_p10 = scmp.ne.s32.totalorder %s145_s1, %s226_s21  ;;  %p232_p12 = scmp.lt.s32.totalorder %s226_s21, %s226_s21 }
  0x22   :  { %171 = vmatpush3.bf16.msra.mxu0 %v184_v2 }
  0x23   :  { %p233_p13 = por %p232_p12, %p231_p11 }
  0x24   :  { %v48_v4 = vld [vmem:[#allocation2] sm:$0xff]  ;;  %v49_v8 = vld [vmem:[#allocation2 + $0x8] sm:$0xff] }
  0x25   :  { %173 = vmatmul.mubr.msk.bf16.vlgmr.msra.gmra.mxu0 %vm73_vm2, %v185_v3  ;;  %p234_p0 = pnand %p233_p13, %p227_p10 }
  0xe5   :  { %v111_v5 = vpop.f32.mrf.mxu0 }
  0xe6   :  { %v118_v6 = vadd.f32 %v111_v5, %v48_v4 }
  0xe7   :  { %v174_v7 = vpop.f32.mrf.mxu0 }
  0xe8   :  { %121 = vst.msk [vmem:[#allocation2] sm:$0xff] %vm45_vm0, %v118_v6 }
  0xe9   :  { %v114_v9 = vpop.f32.mrf.mxu0 }
  0xea   :  { %v119_v10 = vadd.f32 %v114_v9, %v49_v8 }
  0xeb   :  { %v175_v11 = vpop.f32.mrf.mxu0 }
  0xec   :  { %122 = vst.msk [vmem:[#allocation2 + $0x8] sm:$0xff] %vm45_vm0, %v119_v10 }
  0xef   :  { %v126_v12 = vld [vmem:[#allocation2] sm:$0xff] }
  0xf0   :  { %v163_v13 = vpack.c.bf16 %v126_v12, %v126_v12 }
  0xf2   :  { %137 = vst.msk [vmem:[#allocation8] sm:$0xf] %vm136_vm3, %v163_v13 }
  0xf3   :  { %v127_v14 = vld [vmem:[#allocation2 + $0x8] sm:$0xff] }
  0xf4   :  { %v164_v15 = vpack.c.bf16 %v127_v14, %v127_v14 }
  0xf6   :  { %138 = vst.msk [vmem:[#allocation8 + $0x4] sm:$0xf] %vm136_vm3, %v164_v15 }
  0xf7   :  { %237 = shalt.err (!%p234_p0)
}
  0xf8   :  { %150 = dma.vmem_to_hbm [thread:$0]  %s145_s1, 128, %s298_s2, [#allocation5], %s253_s12, %s253_s12, %s254_s13  }
  0xf9   :  { %250 = dma.done.wait [#allocation5], 128  }
  0xfa   :  { %251 = vsyncadd [#allocation5], 4294967168 }
  0xfb   :  { %154 = vsyncpa [#allocation4], 1 }
  0xfc   :  { %155 = vsyncpa [#allocation7], 1 }
  0xfd   :  { %156 = vsyncpa [#allocation5], 1 }

</bundles_post_ra>
